<compile_context>
chip_gen: v7x
topology: tpu7x:2x2x1
jax: 0.10.0
libtpu: 0.0.40
codegen_flags: <defaults>
</compile_context>

<pallas_src>
import jax
import jax.numpy as jnp
from jax.experimental import pallas as pl
from jax.experimental.pallas import tpu as pltpu

LANE = 128     # lane width: hidden (intermediate) feature dim padded to this
SUBLANE = 8    # sublane width: batch dim padded to this


def _round_up(n: int, m: int) -> int:
    return ((n + m - 1) // m) * m


def qnet_kernel(x_ref, w1_ref, b1_ref, w2_ref, b2_ref, out_ref):
    """out = relu(x @ W1 + b1) @ W2 + b2, weights pre-transposed to (in, out)."""
    h = jnp.dot(x_ref[...], w1_ref[...], preferred_element_type=jnp.float32)
    h = jnp.maximum(h + b1_ref[...], 0.0)
    y = jnp.dot(h, w2_ref[...], preferred_element_type=jnp.float32)
    out_ref[...] = (y + b2_ref[...]).astype(out_ref.dtype)


def prepare_params(w1, b1, w2, b2):
    """One-time parameter prep (call at init, NOT per forward).

    PyTorch layout in:  w1 (hidden, state), b1 (hidden,),
                        w2 (action, hidden), b2 (action,).
    Returns weights transposed to (in, out).  The hidden dim is zero-padded to
    a lane multiple (128) so the intermediate activation is lane-dense
    (relu(0)=0 and zero rows of W2 contribute nothing, so math is unchanged).
    The action dim is NOT padded: the kernel writes exactly (batch, action)
    bytes to HBM and no post-kernel slice is needed.
    """
    hidden_dim, state_dim = w1.shape
    action_dim = w2.shape[0]
    h_pad = _round_up(hidden_dim, LANE)

    w1_t = jnp.pad(jnp.asarray(w1, jnp.float32).T, ((0, 0), (0, h_pad - hidden_dim)))
    b1_p = jnp.pad(jnp.asarray(b1, jnp.float32), (0, h_pad - hidden_dim)).reshape(1, h_pad)
    w2_t = jnp.pad(jnp.asarray(w2, jnp.float32).T, ((0, h_pad - hidden_dim), (0, 0)))
    b2_p = jnp.asarray(b2, jnp.float32).reshape(1, action_dim)
    return w1_t, b1_p, w2_t, b2_p


def qnet_forward(x, prepared, *, batch_tile=2048, no_grid_max_batch=4096):
    """QNet forward. `prepared` is the tuple returned by prepare_params()."""
    w1_t, b1_p, w2_t, b2_p = prepared
    batch, state_dim = x.shape
    h_pad = w1_t.shape[1]
    action_dim = w2_t.shape[1]
    x = jnp.asarray(x, jnp.float32)

    if batch <= no_grid_max_batch:
        # Small / medium batch: single no-grid invocation, everything stays in
        # VMEM (no pipeline prologue/epilogue, no double-buffering).  Pad the
        # batch to a sublane multiple so rows are full-vreg.
        b_pad = _round_up(batch, SUBLANE)
        x_in = x if b_pad == batch else jnp.pad(x, ((0, b_pad - batch), (0, 0)))
        out = pl.pallas_call(
            qnet_kernel,
            out_shape=jax.ShapeDtypeStruct((b_pad, action_dim), jnp.float32),
            in_specs=[pl.BlockSpec(memory_space=pltpu.MemorySpace.VMEM)] * 5,
            out_specs=pl.BlockSpec(memory_space=pltpu.MemorySpace.VMEM),
        )(x_in, w1_t, b1_p, w2_t, b2_p)
        return out if b_pad == batch else out[:batch]

    # Large batch: tile ONLY the batch axis.  Force an even grid length >= 2
    # so the "parallel" axis shards evenly across v7x's two TensorCores
    # (neutral on single-TC v5e/v6e), and pad ragged batches up to the tile
    # boundary instead of falling back to an unpipelined whole-batch call.
    steps = max(2, pl.cdiv(batch, batch_tile))
    if steps % 2:
        steps += 1
    tile = _round_up(pl.cdiv(batch, steps), SUBLANE)
    padded = tile * steps
    x_in = x if padded == batch else jnp.pad(x, ((0, padded - batch), (0, 0)))

    out = pl.pallas_call(
        qnet_kernel,
        out_shape=jax.ShapeDtypeStruct((padded, action_dim), jnp.float32),
        grid=(steps,),
        in_specs=[
            pl.BlockSpec((tile, state_dim), lambda i: (i, 0)),
            # Constant index_maps: weights/biases stay VMEM-resident across steps.
            pl.BlockSpec((state_dim, h_pad), lambda i: (0, 0)),
            pl.BlockSpec((1, h_pad), lambda i: (0, 0)),
            pl.BlockSpec((h_pad, action_dim), lambda i: (0, 0)),
            pl.BlockSpec((1, action_dim), lambda i: (0, 0)),
        ],
        out_specs=pl.BlockSpec((tile, action_dim), lambda i: (i, 0)),
        compiler_params=pltpu.CompilerParams(
            dimension_semantics=("parallel",)),
    )(x_in, w1_t, b1_p, w2_t, b2_p)
    return out if padded == batch else out[:batch]


def init_linear_params(key, in_features, out_features):
    # Mirror torch.nn.Linear default init: U(-1/sqrt(fan_in), 1/sqrt(fan_in))
    kw, kb = jax.random.split(key)
    bound = 1.0 / jnp.sqrt(jnp.float32(in_features))
    w = jax.random.uniform(kw, (out_features, in_features), jnp.float32,
                           minval=-bound, maxval=bound)
    b = jax.random.uniform(kb, (out_features,), jnp.float32,
                           minval=-bound, maxval=bound)
    return w, b


def _reference(x, w1, b1, w2, b2):
    return jnp.maximum(x @ w1.T + b1, 0.0) @ w2.T + b2


if __name__ == "__main__":
    # Small shapes consistent with QNet(state_dim, action_dim, hidden_layer_dim)
    batch, state_dim, hidden_dim, action_dim = 4, 16, 32, 8

    key = jax.random.PRNGKey(0)
    kx, k1, k2, kmed, kbig = jax.random.split(key, 5)

    x = jax.random.normal(kx, (batch, state_dim), jnp.float32)
    w1, b1 = init_linear_params(k1, state_dim, hidden_dim)
    w2, b2 = init_linear_params(k2, hidden_dim, action_dim)

    # One-time parameter preparation (transpose + hidden lane padding).
    prepared = prepare_params(w1, b1, w2, b2)

    # Path 1: small batch -> single no-grid invocation (batch padded to 8).
    out = qnet_forward(x, prepared)
    jax.block_until_ready(out)
    ref = _reference(x, w1, b1, w2, b2)
    assert out.shape == (batch, action_dim)
    assert jnp.allclose(out, ref, atol=1e-5, rtol=1e-5)

    # Path 2: medium batch, exact sublane multiple -> no-grid, no padding/slice.
    med_batch = 1024
    x_med = jax.random.normal(kmed, (med_batch, state_dim), jnp.float32)
    out_med = qnet_forward(x_med, prepared)
    jax.block_until_ready(out_med)
    ref_med = _reference(x_med, w1, b1, w2, b2)
    assert out_med.shape == (med_batch, action_dim)
    assert jnp.allclose(out_med, ref_med, atol=1e-5, rtol=1e-5)

    # Path 3: ragged "large" batch -> batch-tiled grid path (thresholds lowered
    # here only to exercise the grid code at a small, fast test size).
    big_batch = 1000
    x_big = jax.random.normal(kbig, (big_batch, state_dim), jnp.float32)
    out_big = qnet_forward(x_big, prepared, batch_tile=256, no_grid_max_batch=512)
    jax.block_until_ready(out_big)
    ref_big = _reference(x_big, w1, b1, w2, b2)
    assert out_big.shape == (big_batch, action_dim)
    assert jnp.allclose(out_big, ref_big, atol=1e-5, rtol=1e-5)

    print("KERNEL_OK")
</pallas_src>

<mosaic_0001>
module attributes {stable_mosaic.version = 11 : i64} {
  func.func @qnet_kernel(%arg0: memref<8x16xf32, #tpu.memory_space<vmem>>, %arg1: memref<16x128xf32, #tpu.memory_space<vmem>>, %arg2: memref<1x128xf32, #tpu.memory_space<vmem>>, %arg3: memref<128x8xf32, #tpu.memory_space<vmem>>, %arg4: memref<1x8xf32, #tpu.memory_space<vmem>>, %arg5: memref<8x8xf32, #tpu.memory_space<vmem>>) attributes {dimension_semantics = [], scalar_prefetch = 0 : i64, scratch_operands = 0 : i64, tpu.core_type = #tpu.core_type<tc>} {
    %c0 = arith.constant 0 : index
    %c0_0 = arith.constant 0 : index
    %0 = vector.load %arg0[%c0, %c0_0] : memref<8x16xf32, #tpu.memory_space<vmem>>, vector<8x16xf32>
    %c0_1 = arith.constant 0 : index
    %c0_2 = arith.constant 0 : index
    %1 = vector.load %arg1[%c0_1, %c0_2] : memref<16x128xf32, #tpu.memory_space<vmem>>, vector<16x128xf32>
    %cst = arith.constant dense<0.000000e+00> : vector<8x128xf32>
    %2 = tpu.matmul %0, %1, %cst {dimension_numbers = #tpu.dot_dimension_numbers<[1], [0], [0], [1], [0, 0, 1, 1], [], []>} : vector<8x16xf32>, vector<16x128xf32>, vector<8x128xf32> -> vector<8x128xf32>
    %c0_3 = arith.constant 0 : index
    %c0_4 = arith.constant 0 : index
    %3 = vector.load %arg2[%c0_3, %c0_4] : memref<1x128xf32, #tpu.memory_space<vmem>>, vector<1x128xf32>
    %4 = vector.broadcast %3 : vector<1x128xf32> to vector<8x128xf32>
    %5 = arith.addf %2, %4 : vector<8x128xf32>
    %cst_5 = arith.constant 0.000000e+00 : f32
    %6 = vector.broadcast %cst_5 : f32 to vector<8x128xf32>
    %7 = arith.maximumf %5, %6 : vector<8x128xf32>
    %c0_6 = arith.constant 0 : index
    %c0_7 = arith.constant 0 : index
    %8 = vector.load %arg3[%c0_6, %c0_7] : memref<128x8xf32, #tpu.memory_space<vmem>>, vector<128x8xf32>
    %cst_8 = arith.constant dense<0.000000e+00> : vector<8x8xf32>
    %9 = tpu.matmul %7, %8, %cst_8 {dimension_numbers = #tpu.dot_dimension_numbers<[1], [0], [0], [1], [0, 0, 1, 1], [], []>} : vector<8x128xf32>, vector<128x8xf32>, vector<8x8xf32> -> vector<8x8xf32>
    %c0_9 = arith.constant 0 : index
    %c0_10 = arith.constant 0 : index
    %10 = vector.load %arg4[%c0_9, %c0_10] : memref<1x8xf32, #tpu.memory_space<vmem>>, vector<1x8xf32>
    %11 = vector.broadcast %10 : vector<1x8xf32> to vector<8x8xf32>
    %12 = arith.addf %9, %11 : vector<8x8xf32>
    %c0_11 = arith.constant 0 : index
    %c0_12 = arith.constant 0 : index
    %13 = vector.load %arg5[%c0_11, %c0_12] : memref<8x8xf32, #tpu.memory_space<vmem>>, vector<8x8xf32>
    tpu.vector_store %arg5[%c0_11, %c0_12], %12 {strides = array<i32>} : memref<8x8xf32, #tpu.memory_space<vmem>>, vector<8x8xf32>,
    return
  }
}

</mosaic_0001>

<bundles_post_ra>
// kernel: tpu_custom_call.1
= control target key start
LH: loop header
LB: loop body
LE: loop exit
PB: predicated region body
PF: predicated region fallthrough
CT: control target
= control target key end

     0   :  { %v335_v2 = vmov 0.0|0.0   ;;  %vm336_vm0 = vmmov 0   ;;  %v337_v4 = vmov 0.0   ;;  %vm31_vm1 = vcmask 130048   ;;  %s444_s0 = inlined_call_operand.vmem [shape: f32[8,16], index: 0, kind: input, shape index: {}]   ;;  %s445_s1 = inlined_call_operand.vmem [shape: f32[16,128], index: 1, kind: input, shape index: {}]   ;;  %s446_s2 = inlined_call_operand.vmem [shape: f32[1,128], index: 2, kind: input, shape index: {}]   ;;  %s447_s3 = inlined_call_operand.vmem [shape: f32[128,8], index: 3, kind: input, shape index: {}]   ;;  %s448_s4 = inlined_call_operand.vmem [shape: f32[1,8], index: 4, kind: input, shape index: {}]   ;;  %s449_s5 = inlined_call_operand.hbm [shape: f32[8,8], index: 5, kind: output, shape index: {}]  }
   0x1   :  { %v22_v0 = vld [vmem:[%s445_s1] sm:$0xff]  ;;  %v23_v1 = vld [vmem:[%s445_s1 + $0x8] sm:$0xff]  ;;  %280 = vmatprep.subr.bf16.mxu0 %v335_v2  ;;  %242 = vmatprep.mubr.msk.f32.mxu0 %vm336_vm0, %v337_v4  ;;  %v108_v7 = vld [vmem:[%s447_s3 + $0x10] sm:$0xff] }
   0x2   :  { %v281_v3 = vpack.c.bf16 %v23_v1, %v22_v0  ;;  %v106_v5 = vld [vmem:[%s447_s3] sm:$0xff]  ;;  %v107_v6 = vld [vmem:[%s447_s3 + $0x8] sm:$0xff]  ;;  %283 = vmatprep.subr.bf16.mxu1 %v335_v2  ;;  %v109_v9 = vld [vmem:[%s447_s3 + $0x18] sm:$0xff]  ;;  %277 = vmatprep.mubr.msk.f32.mxu1 %vm336_vm0, %v337_v4 }
   0x3   :  { %v284_v8 = vpack.c.bf16 %v107_v6, %v106_v5  ;;  %v21_v10 = vld [vmem:[%s444_s0] sm:$0xff]  ;;  %v287_v11 = vpack.c.bf16 %v109_v9, %v108_v7  ;;  %v111_v13 = vld [vmem:[%s447_s3 + $0x28] sm:$0xff] }
   0x4   :  { %282 = vmatpush3.bf16.msra.mxu0 %v281_v3  ;;  %v110_v12 = vld [vmem:[%s447_s3 + $0x20] sm:$0xff] }
   0x5   :  { %285 = vmatpush3.bf16.msra.mxu1 %v284_v8 }
   0x6   :  { %286 = vmatprep.subr.bf16.mxu1 %v335_v2 }
   0x7   :  { %243 = vmatmul.mubr.msk.f32.vlgmr.msra.gmra.mrb[0].mxu0 %vm31_vm1, %v21_v10 }
   0x8   :  { %10 = vsyncpa [#allocation3], 0  ;;  %v290_v14 = vpack.c.bf16 %v111_v13, %v110_v12  ;;  %v112_v15 = vld [vmem:[%s447_s3 + $0x30] sm:$0xff]  ;;  %v113_v16 = vld [vmem:[%s447_s3 + $0x38] sm:$0xff]  ;;  %s338_s7 = smov [#allocation2]   ;;  %vm199_vm2 = vcmask 64512  }
   0x9   :  { %288 = vmatpush3.bf16.msra.mxu1 %v287_v11  ;;  %v293_v17 = vpack.c.bf16 %v113_v16, %v112_v15  ;;  %v114_v18 = vld [vmem:[%s447_s3 + $0x40] sm:$0xff]  ;;  %v115_v19 = vld [vmem:[%s447_s3 + $0x48] sm:$0xff]  ;;  %v116_v21 = vld [vmem:[%s447_s3 + $0x50] sm:$0xff]  ;;  %s207_s8 = sshll.u32 %s338_s7, 4  ;;  %s208_s8 = int_to_ptr.vmem [resolvable:$true] %s207_s8 }
   0xa   :  { %289 = vmatprep.subr.bf16.mxu1 %v335_v2  ;;  %v296_v20 = vpack.c.bf16 %v115_v19, %v114_v18  ;;  %v117_v22 = vld [vmem:[%s447_s3 + $0x58] sm:$0xff]  ;;  %v118_v24 = vld [vmem:[%s447_s3 + $0x60] sm:$0xff]  ;;  %v119_v25 = vld [vmem:[%s447_s3 + $0x68] sm:$0xff]  ;;  %p316_p1 = scmp.lt.s32.totalorder %s208_s8, %s208_s8 }
   0xb   :  { %v299_v23 = vpack.c.bf16 %v117_v22, %v116_v21  ;;  %v302_v26 = vpack.c.bf16 %v119_v25, %v118_v24  ;;  %v120_v27 = vld [vmem:[%s447_s3 + $0x70] sm:$0xff]  ;;  %v121_v28 = vld [vmem:[%s447_s3 + $0x78] sm:$0xff]  ;;  %v215_v30 = vld [vmem:[%s446_s2] ss:$0 sm:$0xff]  ;;  %s311_s3 = scalar_lea.vmem %s208_s8, 128 }
   0xc   :  { %v305_v29 = vpack.c.bf16 %v121_v28, %v120_v27  ;;  %v217_v35 = vld [vmem:[%s448_s4] ss:$0 sm:$0xff]  ;;  %p312_p0 = scmp.ne.s32.totalorder %s208_s8, %s311_s3  ;;  %p317_p2 = scmp.lt.s32.totalorder %s311_s3, %s311_s3 }
   0xd   :  { %291 = vmatpush3.bf16.msra.mxu1 %v290_v14 }
   0xe   :  { %292 = vmatprep.subr.bf16.mxu1 %v335_v2  ;;  %p318_p3 = por %p317_p2, %p316_p1 }
  0x10   :  { %p319_p4 = pnand %p318_p3, %p312_p0 }
  0x11   :  { %294 = vmatpush3.bf16.msra.mxu1 %v293_v17 }
  0x12   :  { %295 = vmatprep.subr.bf16.mxu1 %v335_v2 }
  0x15   :  { %297 = vmatpush3.bf16.msra.mxu1 %v296_v20 }
  0x16   :  { %298 = vmatprep.subr.bf16.mxu1 %v335_v2 }
  0x19   :  { %300 = vmatpush3.bf16.msra.mxu1 %v299_v23 }
  0x1a   :  { %301 = vmatprep.subr.bf16.mxu1 %v335_v2 }
  0x1d   :  { %303 = vmatpush3.bf16.msra.mxu1 %v302_v26 }
  0x1e   :  { %304 = vmatprep.subr.bf16.mxu1 %v335_v2 }
  0x21   :  { %306 = vmatpush3.bf16.msra.mxu1 %v305_v29 }
  0xda   :  { %v101_v31 = vpop.f32.mrb[0].mxu0 }
  0xdb   :  { %v102_v32 = vadd.f32 %v215_v30, %v101_v31  ;;  %v244_v33 = vpop.f32.mrb[1].mxu0 }
  0xdd   :  { %v105_v34 = vmax.f32 %v102_v32, 0.0 }
  0xdf   :  { %278 = vmatmul.mubr.f32.vlgmr.msra.gmra.mrb[0].mxu1 %v105_v34 }
 0x1b2   :  { %v195_v36 = vpop.f32.mrb[0].mxu1 }
 0x1b3   :  { %v196_v37 = vadd.f32 %v217_v35, %v195_v36  ;;  %v279_v38 = vpop.f32.mrb[1].mxu1 }
 0x1b5   :  { %200 = vst.msk [vmem:[#allocation2] sm:$0xff] %vm199_vm2, %v196_v37 }
 0x1b6   :  { %322 = shalt.err (!%p319_p4)
}
 0x1b7   :  { %s323_s10 = scalar_lea.hbm %s449_s5, 128 }
 0x1b8   :  { %p324_p5 = scmp.ne.s32.totalorder %s449_s5, %s323_s10  ;;  %p327_p6 = scmp.lt.u32.totalorder %s323_s10, %s449_s5 }
 0x1ba   :  { %p329_p7 = pnand %p327_p6, %p324_p5 }
 0x1bc   :  { %332 = shalt.err (!%p329_p7)
}
 0x1bd   :  { %210 = dma.vmem_to_hbm [thread:$0]  %s208_s8, 128, %s449_s5, [#allocation3]  }
 0x1be   :  { %333 = dma.done.wait [#allocation3], 128  }
 0x1bf   :  { %334 = vsyncadd [#allocation3], 4294967168 }
 0x1c0   :  { %214 = vsyncpa [#allocation3], 1 }

</bundles_post_ra>
